<compile_context>
chip_gen: v7x
topology: tpu7x:2x2x1
jax: 0.10.0
libtpu: 0.0.40
codegen_flags: <defaults>
</compile_context>

<pallas_src>
import functools

import jax
import jax.numpy as jnp
import numpy as np
from jax import lax
from jax.experimental import pallas as pl
from jax.experimental.pallas import tpu as pltpu


def _sum_inner(a):
    """Sum over all axes except 0, keeping dims -> shape (N, 1, ..., 1)."""
    for ax in range(a.ndim - 1, 0, -1):
        a = jnp.sum(a, axis=ax, keepdims=True)
    return a


def _bce_dice_kernel(x_ref, t_ref, out_ref,
                     bce_acc, inter_acc, sig_acc, tgt_acc, *,
                     feat, block_inner, need_mask,
                     n_samples, total_elems, smooth, bce_w, dice_w):
    step = pl.program_id(0)

    @pl.when(step == 0)
    def _():
        bce_acc[...] = jnp.zeros_like(bce_acc)
        inter_acc[...] = jnp.zeros_like(inter_acc)
        sig_acc[...] = jnp.zeros_like(sig_acc)
        tgt_acc[...] = jnp.zeros_like(tgt_acc)

    # Per-block upcast (inputs may be bf16 / low precision); accumulate in f32.
    x = x_ref[...].astype(jnp.float32)
    t = t_ref[...].astype(jnp.float32)

    # One shared exp(-|x|) feeds both the stable BCE-with-logits term and sigmoid.
    e = jnp.exp(-jnp.abs(x))
    bce_elem = jnp.maximum(x, 0.0) - x * t + jnp.log1p(e)

    one_plus_e = 1.0 + e
    inv = pl.reciprocal(one_plus_e, approx=True)       # EUP-cheap approx rcp
    inv = inv * (2.0 - one_plus_e * inv)               # one Newton step (VPU)
    sig = jnp.where(x >= 0.0, inv, e * inv)            # sigmoid(x)

    if need_mask:
        # Flat per-sample element index for this block; mask out-of-range lanes
        # of the partial last block (replaces the old wrapper-side jnp.pad).
        rank = x.ndim
        idx = lax.broadcasted_iota(jnp.int32, x.shape, rank - 1)
        mult = x.shape[-1]
        for ax in range(rank - 2, 0, -1):
            idx = idx + lax.broadcasted_iota(jnp.int32, x.shape, ax) * mult
            mult *= x.shape[ax]
        valid = (idx + step * block_inner) < feat
        bce_elem = jnp.where(valid, bce_elem, 0.0)
        sig = jnp.where(valid, sig, 0.0)
        t = jnp.where(valid, t, 0.0)

    # Block-shaped, pure-VPU accumulation (no per-step cross-lane reductions).
    bce_acc[...] += bce_elem
    inter_acc[...] += sig * t
    sig_acc[...] += sig
    tgt_acc[...] += t

    @pl.when(step == pl.num_programs(0) - 1)
    def _():
        bce = jnp.sum(_sum_inner(bce_acc[...])) / jnp.float32(total_elems)
        inter = _sum_inner(inter_acc[...])
        s_sum = _sum_inner(sig_acc[...])
        t_sum = _sum_inner(tgt_acc[...])
        dice = (2.0 * inter + smooth) / (s_sum + t_sum + smooth)
        dice_loss = 1.0 - jnp.sum(dice) / jnp.float32(n_samples)
        out_ref[0, 0] = bce_w * bce + dice_w * dice_loss


def bce_dice_loss(input_logits, target, *, target_block_elems=256 * 1024):
    """Pallas implementation of BCEDiceLoss.forward. Returns a scalar f32."""
    assert input_logits.shape == target.shape
    n = input_logits.shape[0]
    feat = int(np.prod(input_logits.shape[1:]))

    if feat % 128 == 0:
        # Fast path: (N, F//128, 128) layout -> full sublane occupancy even for
        # small N; big blocks along the row axis.
        fr = feat // 128
        x_in = input_logits.reshape(n, fr, 128)
        t_in = target.reshape(n, fr, 128)
        rows_target = max(8, (target_block_elems // (n * 128)) // 8 * 8)
        r = fr if fr <= rows_target else rows_target
        grid = (pl.cdiv(fr, r),)
        block = (n, r, 128)
        index_map = lambda i: (0, i, 0)
        need_mask = (fr % r) != 0
        block_inner = r * 128
    else:
        # Fallback for F not a multiple of 128: 2-D (N, TILE) blocks, in-kernel
        # lane masking of the partial last block. No HBM padding copies.
        x_in = input_logits.reshape(n, feat)
        t_in = target.reshape(n, feat)
        lane_target = max(128, (target_block_elems // n) // 128 * 128)
        tile = feat if feat <= lane_target else lane_target
        grid = (pl.cdiv(feat, tile),)
        block = (n, tile)
        index_map = lambda i: (0, i)
        need_mask = (feat % tile) != 0
        block_inner = tile

    kernel = functools.partial(
        _bce_dice_kernel,
        feat=feat, block_inner=block_inner, need_mask=need_mask,
        n_samples=n, total_elems=n * feat,
        smooth=1e-05, bce_w=0.9, dice_w=0.1)

    # VMEM budget: double-buffered inputs + 4 block-sized f32 accumulators
    # + headroom for compiler temporaries. Capped to stay safe on v7x (64 MiB).
    block_elems = int(np.prod(block))
    vmem_bytes = 2 * block_elems * (x_in.dtype.itemsize + t_in.dtype.itemsize)
    vmem_bytes += 4 * block_elems * 4
    vmem_bytes += 16 * 1024 * 1024
    vmem_limit = min(48 * 1024 * 1024, max(32 * 1024 * 1024, vmem_bytes))

    out = pl.pallas_call(
        kernel,
        out_shape=jax.ShapeDtypeStruct((1, 1), jnp.float32),
        grid=grid,
        in_specs=[
            pl.BlockSpec(block, index_map),
            pl.BlockSpec(block, index_map),
        ],
        out_specs=pl.BlockSpec(memory_space=pltpu.MemorySpace.SMEM),
        scratch_shapes=[pltpu.VMEM(block, jnp.float32)] * 4,
        compiler_params=pltpu.CompilerParams(
            dimension_semantics=("arbitrary",),   # the grid axis is a reduction
            vmem_limit_bytes=vmem_limit),
    )(x_in, t_in)
    return out[0, 0]


def _bce_dice_ref(input_logits, target):
    """Plain-JAX reference mirroring the PyTorch module, for validation."""
    x = input_logits.astype(jnp.float32)
    t = target.astype(jnp.float32)
    bce = jnp.mean(jnp.maximum(x, 0.0) - x * t + jnp.log1p(jnp.exp(-jnp.abs(x))))
    smooth = 1e-05
    n = x.shape[0]
    sig = jax.nn.sigmoid(x).reshape(n, -1)
    tt = t.reshape(n, -1)
    inter = jnp.sum(sig * tt, axis=1)
    dice = (2.0 * inter + smooth) / (jnp.sum(sig, axis=1) + jnp.sum(tt, axis=1) + smooth)
    dice_loss = 1.0 - jnp.sum(dice) / n
    return 0.9 * bce + 0.1 * dice_loss


def _check(loss, ref, rtol=1e-5, atol=1e-5):
    np.testing.assert_allclose(np.asarray(loss), np.asarray(ref),
                               rtol=rtol, atol=atol)


if __name__ == "__main__":
    key = jax.random.PRNGKey(0)
    k1, k2, k3, k4, k5, k6 = jax.random.split(key, 6)

    # Case 1: N=2, C=4, H=W=16 (F = 1024): 3-D fast path, single block.
    logits = jax.random.normal(k1, (2, 4, 16, 16), dtype=jnp.float32)
    target = (jax.random.uniform(k2, (2, 4, 16, 16)) > 0.5).astype(jnp.float32)
    loss = jax.block_until_ready(bce_dice_loss(logits, target))
    _check(loss, _bce_dice_ref(logits, target))

    # Case 2: F = 300 (not a multiple of 128): 2-D fallback path.
    logits2 = jax.random.normal(k3, (2, 3, 10, 10), dtype=jnp.float32)
    target2 = (jax.random.uniform(k4, (2, 3, 10, 10)) > 0.5).astype(jnp.float32)
    loss2 = jax.block_until_ready(bce_dice_loss(logits2, target2))
    _check(loss2, _bce_dice_ref(logits2, target2))

    # Case 3: F = 2304 with a tiny block target -> multi-step grid + in-kernel
    # row masking of the partial last block on the 3-D path.
    logits3 = jax.random.normal(k5, (2, 4, 24, 24), dtype=jnp.float32)
    target3 = (jax.random.uniform(k6, (2, 4, 24, 24)) > 0.5).astype(jnp.float32)
    loss3 = jax.block_until_ready(
        bce_dice_loss(logits3, target3, target_block_elems=4096))
    _check(loss3, _bce_dice_ref(logits3, target3))

    # Case 4: F = 363 with a tiny block target -> multi-step grid + lane masking
    # on the 2-D fallback path.
    logits4 = jax.random.normal(k1, (2, 3, 11, 11), dtype=jnp.float32)
    target4 = (jax.random.uniform(k2, (2, 3, 11, 11)) > 0.5).astype(jnp.float32)
    loss4 = jax.block_until_ready(
        bce_dice_loss(logits4, target4, target_block_elems=256))
    _check(loss4, _bce_dice_ref(logits4, target4))

    # Case 5: bf16 logits/targets fed straight through (kernel upcasts per block).
    logits5 = logits.astype(jnp.bfloat16)
    target5 = target.astype(jnp.bfloat16)
    loss5 = jax.block_until_ready(bce_dice_loss(logits5, target5))
    _check(loss5, _bce_dice_ref(logits5, target5))

    print("KERNEL_OK")
</pallas_src>

<mosaic_0001>
module attributes {stable_mosaic.version = 11 : i64} {
  func.func @_bce_dice_kernel(%arg0: i32, %arg1: memref<2x8x128xf32, #tpu.memory_space<vmem>>, %arg2: memref<2x8x128xf32, #tpu.memory_space<vmem>>, %arg3: memref<1x1xf32, #tpu.memory_space<smem>>, %arg4: memref<2x8x128xf32, #tpu.memory_space<vmem>>, %arg5: memref<2x8x128xf32, #tpu.memory_space<vmem>>, %arg6: memref<2x8x128xf32, #tpu.memory_space<vmem>>, %arg7: memref<2x8x128xf32, #tpu.memory_space<vmem>>) attributes {dimension_semantics = [#tpu.dimension_semantics<arbitrary>], iteration_bounds = array<i64: 1>, scalar_prefetch = 0 : i64, scratch_operands = 4 : i64, tpu.core_type = #tpu.core_type<tc>, window_params = [{transform_indices = @transform_0, window_bounds = array<i64: 2, 8, 128>}, {transform_indices = @transform_1, window_bounds = array<i64: 2, 8, 128>}, {transform_indices = @transform_2, window_bounds = array<i64: 1, 1>}]} {
    %c0_i32 = arith.constant 0 : i32
    %0 = arith.cmpi eq, %arg0, %c0_i32 : i32
    %1 = arith.extui %0 : i1 to i32
    %c0_i32_0 = arith.constant 0 : i32
    %2 = arith.cmpi ne, %1, %c0_i32_0 : i32
    scf.if %2 {
      %cst_36 = arith.constant 0.000000e+00 : f32
      %42 = vector.broadcast %cst_36 : f32 to vector<2x8x128xf32>
      %c0_37 = arith.constant 0 : index
      %c0_38 = arith.constant 0 : index
      %c0_39 = arith.constant 0 : index
      %43 = vector.load %arg4[%c0_37, %c0_38, %c0_39] : memref<2x8x128xf32, #tpu.memory_space<vmem>>, vector<2x8x128xf32>
      tpu.vector_store %arg4[%c0_37, %c0_38, %c0_39], %42 {strides = array<i32>} : memref<2x8x128xf32, #tpu.memory_space<vmem>>, vector<2x8x128xf32>,
      %cst_40 = arith.constant 0.000000e+00 : f32
      %44 = vector.broadcast %cst_40 : f32 to vector<2x8x128xf32>
      %c0_41 = arith.constant 0 : index
      %c0_42 = arith.constant 0 : index
      %c0_43 = arith.constant 0 : index
      %45 = vector.load %arg5[%c0_41, %c0_42, %c0_43] : memref<2x8x128xf32, #tpu.memory_space<vmem>>, vector<2x8x128xf32>
      tpu.vector_store %arg5[%c0_41, %c0_42, %c0_43], %44 {strides = array<i32>} : memref<2x8x128xf32, #tpu.memory_space<vmem>>, vector<2x8x128xf32>,
      %cst_44 = arith.constant 0.000000e+00 : f32
      %46 = vector.broadcast %cst_44 : f32 to vector<2x8x128xf32>
      %c0_45 = arith.constant 0 : index
      %c0_46 = arith.constant 0 : index
      %c0_47 = arith.constant 0 : index
      %47 = vector.load %arg6[%c0_45, %c0_46, %c0_47] : memref<2x8x128xf32, #tpu.memory_space<vmem>>, vector<2x8x128xf32>
      tpu.vector_store %arg6[%c0_45, %c0_46, %c0_47], %46 {strides = array<i32>} : memref<2x8x128xf32, #tpu.memory_space<vmem>>, vector<2x8x128xf32>,
      %cst_48 = arith.constant 0.000000e+00 : f32
      %48 = vector.broadcast %cst_48 : f32 to vector<2x8x128xf32>
      %c0_49 = arith.constant 0 : index
      %c0_50 = arith.constant 0 : index
      %c0_51 = arith.constant 0 : index
      %49 = vector.load %arg7[%c0_49, %c0_50, %c0_51] : memref<2x8x128xf32, #tpu.memory_space<vmem>>, vector<2x8x128xf32>
      tpu.vector_store %arg7[%c0_49, %c0_50, %c0_51], %48 {strides = array<i32>} : memref<2x8x128xf32, #tpu.memory_space<vmem>>, vector<2x8x128xf32>,
    } else {
    }
    %c0 = arith.constant 0 : index
    %c0_1 = arith.constant 0 : index
    %c0_2 = arith.constant 0 : index
    %3 = vector.load %arg1[%c0, %c0_1, %c0_2] : memref<2x8x128xf32, #tpu.memory_space<vmem>>, vector<2x8x128xf32>
    %c0_3 = arith.constant 0 : index
    %c0_4 = arith.constant 0 : index
    %c0_5 = arith.constant 0 : index
    %4 = vector.load %arg2[%c0_3, %c0_4, %c0_5] : memref<2x8x128xf32, #tpu.memory_space<vmem>>, vector<2x8x128xf32>
    %5 = math.absf %3 : vector<2x8x128xf32>
    %cst = arith.constant 0.000000e+00 : f32
    %6 = vector.broadcast %cst : f32 to vector<2x8x128xf32>
    %7 = arith.subf %6, %5 : vector<2x8x128xf32>
    %8 = math.exp %7 : vector<2x8x128xf32>
    %cst_6 = arith.constant 0.000000e+00 : f32
    %9 = vector.broadcast %cst_6 : f32 to vector<2x8x128xf32>
    %10 = arith.maximumf %3, %9 : vector<2x8x128xf32>
    %11 = arith.mulf %3, %4 : vector<2x8x128xf32>
    %12 = arith.subf %10, %11 : vector<2x8x128xf32>
    %13 = math.log1p %8 : vector<2x8x128xf32>
    %14 = arith.addf %12, %13 : vector<2x8x128xf32>
    %cst_7 = arith.constant 1.000000e+00 : f32
    %15 = vector.broadcast %cst_7 : f32 to vector<2x8x128xf32>
    %16 = arith.addf %15, %8 : vector<2x8x128xf32>
    %17 = tpu.reciprocal %16 {approx = true} : vector<2x8x128xf32> -> vector<2x8x128xf32>
    %18 = arith.mulf %16, %17 : vector<2x8x128xf32>
    %cst_8 = arith.constant 2.000000e+00 : f32
    %19 = vector.broadcast %cst_8 : f32 to vector<2x8x128xf32>
    %20 = arith.subf %19, %18 : vector<2x8x128xf32>
    %21 = arith.mulf %17, %20 : vector<2x8x128xf32>
    %cst_9 = arith.constant 0.000000e+00 : f32
    %22 = vector.broadcast %cst_9 : f32 to vector<2x8x128xf32>
    %23 = arith.cmpf oge, %3, %22 : vector<2x8x128xf32>
    %24 = arith.mulf %8, %21 : vector<2x8x128xf32>
    %25 = arith.select %23, %21, %24 : vector<2x8x128xi1>, vector<2x8x128xf32>
    %c0_10 = arith.constant 0 : index
    %c0_11 = arith.constant 0 : index
    %c0_12 = arith.constant 0 : index
    %26 = vector.load %arg4[%c0_10, %c0_11, %c0_12] : memref<2x8x128xf32, #tpu.memory_space<vmem>>, vector<2x8x128xf32>
    %27 = arith.addf %26, %14 : vector<2x8x128xf32>
    %c0_13 = arith.constant 0 : index
    %c0_14 = arith.constant 0 : index
    %c0_15 = arith.constant 0 : index
    %28 = vector.load %arg4[%c0_13, %c0_14, %c0_15] : memref<2x8x128xf32, #tpu.memory_space<vmem>>, vector<2x8x128xf32>
    tpu.vector_store %arg4[%c0_13, %c0_14, %c0_15], %27 {strides = array<i32>} : memref<2x8x128xf32, #tpu.memory_space<vmem>>, vector<2x8x128xf32>,
    %c0_16 = arith.constant 0 : index
    %c0_17 = arith.constant 0 : index
    %c0_18 = arith.constant 0 : index
    %29 = vector.load %arg5[%c0_16, %c0_17, %c0_18] : memref<2x8x128xf32, #tpu.memory_space<vmem>>, vector<2x8x128xf32>
    %30 = arith.mulf %25, %4 : vector<2x8x128xf32>
    %31 = arith.addf %29, %30 : vector<2x8x128xf32>
    %c0_19 = arith.constant 0 : index
    %c0_20 = arith.constant 0 : index
    %c0_21 = arith.constant 0 : index
    %32 = vector.load %arg5[%c0_19, %c0_20, %c0_21] : memref<2x8x128xf32, #tpu.memory_space<vmem>>, vector<2x8x128xf32>
    tpu.vector_store %arg5[%c0_19, %c0_20, %c0_21], %31 {strides = array<i32>} : memref<2x8x128xf32, #tpu.memory_space<vmem>>, vector<2x8x128xf32>,
    %c0_22 = arith.constant 0 : index
    %c0_23 = arith.constant 0 : index
    %c0_24 = arith.constant 0 : index
    %33 = vector.load %arg6[%c0_22, %c0_23, %c0_24] : memref<2x8x128xf32, #tpu.memory_space<vmem>>, vector<2x8x128xf32>
    %34 = arith.addf %33, %25 : vector<2x8x128xf32>
    %c0_25 = arith.constant 0 : index
    %c0_26 = arith.constant 0 : index
    %c0_27 = arith.constant 0 : index
    %35 = vector.load %arg6[%c0_25, %c0_26, %c0_27] : memref<2x8x128xf32, #tpu.memory_space<vmem>>, vector<2x8x128xf32>
    tpu.vector_store %arg6[%c0_25, %c0_26, %c0_27], %34 {strides = array<i32>} : memref<2x8x128xf32, #tpu.memory_space<vmem>>, vector<2x8x128xf32>,
    %c0_28 = arith.constant 0 : index
    %c0_29 = arith.constant 0 : index
    %c0_30 = arith.constant 0 : index
    %36 = vector.load %arg7[%c0_28, %c0_29, %c0_30] : memref<2x8x128xf32, #tpu.memory_space<vmem>>, vector<2x8x128xf32>
    %37 = arith.addf %36, %4 : vector<2x8x128xf32>
    %c0_31 = arith.constant 0 : index
    %c0_32 = arith.constant 0 : index
    %c0_33 = arith.constant 0 : index
    %38 = vector.load %arg7[%c0_31, %c0_32, %c0_33] : memref<2x8x128xf32, #tpu.memory_space<vmem>>, vector<2x8x128xf32>
    tpu.vector_store %arg7[%c0_31, %c0_32, %c0_33], %37 {strides = array<i32>} : memref<2x8x128xf32, #tpu.memory_space<vmem>>, vector<2x8x128xf32>,
    %c0_i32_34 = arith.constant 0 : i32
    %39 = arith.cmpi eq, %arg0, %c0_i32_34 : i32
    %40 = arith.extui %39 : i1 to i32
    %c0_i32_35 = arith.constant 0 : i32
    %41 = arith.cmpi ne, %40, %c0_i32_35 : i32
    scf.if %41 {
      %c0_36 = arith.constant 0 : index
      %c0_37 = arith.constant 0 : index
      %c0_38 = arith.constant 0 : index
      %42 = vector.load %arg4[%c0_36, %c0_37, %c0_38] : memref<2x8x128xf32, #tpu.memory_space<vmem>>, vector<2x8x128xf32>
      %cst_39 = arith.constant dense<0.000000e+00> : vector<2x8xf32>
      %43 = vector.multi_reduction <add>, %42, %cst_39 [2] : vector<2x8x128xf32> to vector<2x8xf32>
      %44 = vector.shape_cast %43 : vector<2x8xf32> to vector<2x8x1xf32>
      %cst_40 = arith.constant dense<0.000000e+00> : vector<2x1xf32>
      %45 = vector.multi_reduction <add>, %44, %cst_40 [1] : vector<2x8x1xf32> to vector<2x1xf32>
      %46 = vector.shape_cast %45 : vector<2x1xf32> to vector<2x1x1xf32>
      %47 = vector.shape_cast %46 : vector<2x1x1xf32> to vector<1x2x1x1xf32>
      %cst_41 = arith.constant dense<0.000000e+00> : vector<1xf32>
      %48 = vector.multi_reduction <add>, %47, %cst_41 [1, 2, 3] : vector<1x2x1x1xf32> to vector<1xf32>
      %49 = vector.shape_cast %48 : vector<1xf32> to vector<1x1x1x1xf32>
      %50 = vector.extract %49[0, 0, 0, 0] : f32 from vector<1x1x1x1xf32>
      %cst_42 = arith.constant 2.048000e+03 : f32
      %51 = arith.divf %50, %cst_42 : f32
      %c0_43 = arith.constant 0 : index
      %c0_44 = arith.constant 0 : index
      %c0_45 = arith.constant 0 : index
      %52 = vector.load %arg5[%c0_43, %c0_44, %c0_45] : memref<2x8x128xf32, #tpu.memory_space<vmem>>, vector<2x8x128xf32>
      %cst_46 = arith.constant dense<0.000000e+00> : vector<2x8xf32>
      %53 = vector.multi_reduction <add>, %52, %cst_46 [2] : vector<2x8x128xf32> to vector<2x8xf32>
      %54 = vector.shape_cast %53 : vector<2x8xf32> to vector<2x8x1xf32>
      %cst_47 = arith.constant dense<0.000000e+00> : vector<2x1xf32>
      %55 = vector.multi_reduction <add>, %54, %cst_47 [1] : vector<2x8x1xf32> to vector<2x1xf32>
      %56 = vector.shape_cast %55 : vector<2x1xf32> to vector<2x1x1xf32>
      %c0_48 = arith.constant 0 : index
      %c0_49 = arith.constant 0 : index
      %c0_50 = arith.constant 0 : index
      %57 = vector.load %arg6[%c0_48, %c0_49, %c0_50] : memref<2x8x128xf32, #tpu.memory_space<vmem>>, vector<2x8x128xf32>
      %cst_51 = arith.constant dense<0.000000e+00> : vector<2x8xf32>
      %58 = vector.multi_reduction <add>, %57, %cst_51 [2] : vector<2x8x128xf32> to vector<2x8xf32>
      %59 = vector.shape_cast %58 : vector<2x8xf32> to vector<2x8x1xf32>
      %cst_52 = arith.constant dense<0.000000e+00> : vector<2x1xf32>
      %60 = vector.multi_reduction <add>, %59, %cst_52 [1] : vector<2x8x1xf32> to vector<2x1xf32>
      %61 = vector.shape_cast %60 : vector<2x1xf32> to vector<2x1x1xf32>
      %c0_53 = arith.constant 0 : index
      %c0_54 = arith.constant 0 : index
      %c0_55 = arith.constant 0 : index
      %62 = vector.load %arg7[%c0_53, %c0_54, %c0_55] : memref<2x8x128xf32, #tpu.memory_space<vmem>>, vector<2x8x128xf32>
      %cst_56 = arith.constant dense<0.000000e+00> : vector<2x8xf32>
      %63 = vector.multi_reduction <add>, %62, %cst_56 [2] : vector<2x8x128xf32> to vector<2x8xf32>
      %64 = vector.shape_cast %63 : vector<2x8xf32> to vector<2x8x1xf32>
      %cst_57 = arith.constant dense<0.000000e+00> : vector<2x1xf32>
      %65 = vector.multi_reduction <add>, %64, %cst_57 [1] : vector<2x8x1xf32> to vector<2x1xf32>
      %66 = vector.shape_cast %65 : vector<2x1xf32> to vector<2x1x1xf32>
      %cst_58 = arith.constant 2.000000e+00 : f32
      %67 = vector.broadcast %cst_58 : f32 to vector<2x1x1xf32>
      %68 = arith.mulf %67, %56 : vector<2x1x1xf32>
      %cst_59 = arith.constant 9.99999974E-6 : f32
      %69 = vector.broadcast %cst_59 : f32 to vector<2x1x1xf32>
      %70 = arith.addf %68, %69 : vector<2x1x1xf32>
      %71 = arith.addf %61, %66 : vector<2x1x1xf32>
      %cst_60 = arith.constant 9.99999974E-6 : f32
      %72 = vector.broadcast %cst_60 : f32 to vector<2x1x1xf32>
      %73 = arith.addf %71, %72 : vector<2x1x1xf32>
      %74 = arith.divf %70, %73 : vector<2x1x1xf32>
      %75 = vector.shape_cast %74 : vector<2x1x1xf32> to vector<1x2x1x1xf32>
      %cst_61 = arith.constant dense<0.000000e+00> : vector<1xf32>
      %76 = vector.multi_reduction <add>, %75, %cst_61 [1, 2, 3] : vector<1x2x1x1xf32> to vector<1xf32>
      %77 = vector.shape_cast %76 : vector<1xf32> to vector<1x1x1x1xf32>
      %78 = vector.extract %77[0, 0, 0, 0] : f32 from vector<1x1x1x1xf32>
      %cst_62 = arith.constant 2.000000e+00 : f32
      %79 = arith.divf %78, %cst_62 : f32
      %cst_63 = arith.constant 1.000000e+00 : f32
      %80 = arith.subf %cst_63, %79 : f32
      %cst_64 = arith.constant 0.899999976 : f32
      %81 = arith.mulf %cst_64, %51 : f32
      %cst_65 = arith.constant 1.000000e-01 : f32
      %82 = arith.mulf %cst_65, %80 : f32
      %83 = arith.addf %81, %82 : f32
      %c0_66 = arith.constant 0 : index
      %c0_67 = arith.constant 0 : index
      %84 = memref.load %arg3[%c0_66, %c0_67] : memref<1x1xf32, #tpu.memory_space<smem>>
      memref.store %83, %arg3[%c0_66, %c0_67] : memref<1x1xf32, #tpu.memory_space<smem>>
    } else {
    }
    return
  }
  func.func @transform_0(%arg0: i32) -> (i32, i32, i32) {
    %c0_i32 = arith.constant 0 : i32
    %c0_i32_0 = arith.constant 0 : i32
    %c0_i32_1 = arith.constant 0 : i32
    return %c0_i32, %arg0, %c0_i32_0 : i32, i32, i32
  }
  func.func @transform_1(%arg0: i32) -> (i32, i32, i32) {
    %c0_i32 = arith.constant 0 : i32
    %c0_i32_0 = arith.constant 0 : i32
    %c0_i32_1 = arith.constant 0 : i32
    return %c0_i32, %arg0, %c0_i32_0 : i32, i32, i32
  }
  func.func @transform_2(%arg0: i32) -> (i32, i32) {
    %c0_i32 = arith.constant 0 : i32
    %c0_i32_0 = arith.constant 0 : i32
    %c0_i32_1 = arith.constant 0 : i32
    return %c0_i32, %c0_i32_0 : i32, i32
  }
}

</mosaic_0001>

<bundles_post_ra>
// kernel: tpu_custom_call.1
= control target key start
LH: loop header
LB: loop body
LE: loop exit
PB: predicated region body
PF: predicated region fallthrough
CT: control target
= control target key end

     0   :  { %7 = vsyncpa [#allocation7], 0  ;;  %s422_s0 = inlined_call_operand.hbm [shape: f32[2,8,128], index: 0, kind: input, shape index: {}]   ;;  %s423_s1 = inlined_call_operand.hbm [shape: f32[2,8,128], index: 1, kind: input, shape index: {}]   ;;  %s424_s2 = inlined_call_operand.hbm [shape: f32[1,1], index: 2, kind: output, shape index: {}]  }
   0x1   :  { %8 = vsyncpa [#allocation10], 0 }
   0x2   :  { %9 = vsyncpa [#allocation8], 0  ;;  %s356_s9 = smov [#allocation6]   ;;  %s296_s13 = scalar_lea.hbm %s422_s0, 256 }
   0x3   :  { %s15_s10 = sshll.u32 %s356_s9, 4  ;;  %p297_p0 = scmp.ne.s32.totalorder %s422_s0, %s296_s13  ;;  %s16_s10 = int_to_ptr.vmem [resolvable:$true] %s15_s10 }
   0x4   :  { %p300_p1 = scmp.lt.u32.totalorder %s296_s13, %s422_s0 }
   0x6   :  { %p302_p2 = pnand %p300_p1, %p297_p0 }
   0x8   :  { %305 = shalt.err (!%p302_p2)
}
   0x9   :  { %s306_s18 = scalar_lea.vmem %s16_s10, 256  ;;  %p311_p4 = scmp.lt.s32.totalorder %s16_s10, %s16_s10 }
   0xa   :  { %p307_p3 = scmp.ne.s32.totalorder %s16_s10, %s306_s18  ;;  %p312_p5 = scmp.lt.s32.totalorder %s306_s18, %s306_s18 }
   0xc   :  { %p313_p6 = por %p312_p5, %p311_p4 }
   0xe   :  { %p314_p7 = pnand %p313_p6, %p307_p3 }
  0x10   :  { %317 = shalt.err (!%p314_p7)
}
  0x11   :  { %s357_s19 = smov 128   ;;  %s358_s20 = smov 8  }
  0x12   :  { %21 = dma.hbm_to_vmem [thread:$0]  %s422_s0, 256, %s16_s10, [#allocation7], %s357_s19, %s357_s19, %s358_s20  }
  0x13   :  { %s359_s23 = smov [#allocation9]   ;;  %s318_s27 = scalar_lea.hbm %s423_s1, 256 }
  0x14   :  { %s27_s24 = sshll.u32 %s359_s23, 4  ;;  %p319_p8 = scmp.ne.s32.totalorder %s423_s1, %s318_s27  ;;  %s28_s24 = int_to_ptr.vmem [resolvable:$true] %s27_s24 }
  0x15   :  { %p322_p9 = scmp.lt.u32.totalorder %s318_s27, %s423_s1 }
  0x17   :  { %p324_p10 = pnand %p322_p9, %p319_p8 }
  0x19   :  { %327 = shalt.err (!%p324_p10)
}
  0x1a   :  { %s328_s4 = scalar_lea.vmem %s28_s24, 256  ;;  %p333_p12 = scmp.lt.s32.totalorder %s28_s24, %s28_s24 }
  0x1b   :  { %p329_p11 = scmp.ne.s32.totalorder %s28_s24, %s328_s4  ;;  %p334_p13 = scmp.lt.s32.totalorder %s328_s4, %s328_s4 }
  0x1d   :  { %p335_p0 = por %p334_p13, %p333_p12 }
  0x1f   :  { %p336_p1 = pnand %p335_p0, %p329_p11 }
  0x21   :  { %339 = shalt.err (!%p336_p1)
}
  0x22   :  { %33 = dma.hbm_to_vmem [thread:$0]  %s423_s1, 256, %s28_s24, [#allocation10], %s357_s19, %s357_s19, %s358_s20  }
  0x23   :  { %350 = dma.done.wait [#allocation7], 256  }
  0x24   :  { %351 = vsyncadd [#allocation7], 4294967040 }
  0x25   :  { %352 = dma.done.wait [#allocation10], 256  }
  0x26   :  { %353 = vsyncadd [#allocation10], 4294967040  ;;  %v54_v0 = vld [vmem:[#allocation9] sm:$0xff]  ;;  %v52_v1 = vld [vmem:[#allocation6] sm:$0xff]  ;;  %vm153_vm4 = vcmask 0   ;;  %s340_s15 = scalar_lea.hbm %s424_s2, 16 }
  0x27   :  { %207 = vadd.xlane.f32.xlu1 %v54_v0  ;;  %v56_v2 = vand.u32 2147483647, %v52_v1  ;;  %v53_v3 = vld [vmem:[#allocation6 + $0x8] sm:$0xff]  ;;  %v55_v4 = vld [vmem:[#allocation9 + $0x8] sm:$0xff]  ;;  %vm100_vm0 = vcmp.ge.f32.partialorder %v52_v1, 0.0  ;;  %v66_v39 = vmul.f32 %v54_v0, %v52_v1  ;;  %v64_v42 = vmax.f32 %v52_v1, 0.0  ;;  %p341_p2 = scmp.ne.s32.totalorder %s424_s2, %s340_s15  ;;  %p344_p3 = scmp.lt.u32.totalorder %s340_s15, %s424_s2 }
  0x28   :  { %v57_v5 = vand.u32 2147483647, %v53_v3  ;;  %v67_v25 = vmul.f32 %v55_v4, %v53_v3  ;;  %v65_v27 = vmax.f32 %v53_v3, 0.0  ;;  %vm101_vm1 = vcmp.ge.f32.partialorder %v53_v3, 0.0 }
  0x29   :  { %v58_v6 = vsub.f32 0.0, %v56_v2  ;;  %v68_v48 = vsub.f32 %v64_v42, %v66_v39  ;;  %p346_p4 = pnand %p344_p3, %p341_p2 }
  0x2a   :  { %v59_v7 = vsub.f32 0.0, %v57_v5  ;;  %v69_v38 = vsub.f32 %v65_v27, %v67_v25 }
  0x2b   :  { %v60_v8 = vmul.f32 1.442695, %v58_v6  ;;  %209 = vadd.xlane.f32.xlu1 %v55_v4 }
  0x2c   :  { %v62_v9 = vmul.f32 1.442695, %v59_v7 }
  0x2d   :  { %280 = vpow2.f32 %v60_v8 }
  0x2e   :  { %282 = vpow2.f32 %v62_v9 }
  0x37   :  { %v281_v10 = vpop.eup %280 }
  0x38   :  { %v283_v11 = vpop.eup %282  ;;  %v70_v12 = vadd.f32 1.0, %v281_v10  ;;  %v73_v23 = vmul.f32 -0.5, %v281_v10  ;;  %v76_v36 = vand.u32 2147483647, %v281_v10 }
  0x39   :  { %v79_v13 = vadd.f32 1.0, %v283_v11  ;;  %v82_v14 = vmul.f32 -0.5, %v283_v11  ;;  %v85_v22 = vand.u32 2147483647, %v283_v11 }
  0x3a   :  { %284 = vrcp.f32 %v70_v12  ;;  %v74_v33 = vadd.f32 1.0, %v73_v23  ;;  %vm77_vm3 = vcmp.lt.f32.partialorder %v76_v36, 0.0004427343 }
  0x3b   :  { %286 = vrcp.f32 %v79_v13  ;;  %v83_v19 = vadd.f32 1.0, %v82_v14  ;;  %vm400_vm2 = vcmp.lt.f32.partialorder %v85_v22, 0.0004427343 }
  0x3c   :  { %288 = vlog2.f32 %v79_v13  ;;  %v75_v45 = vmul.f32 %v281_v10, %v74_v33 }
  0x3d   :  { %290 = vlog2.f32 %v70_v12  ;;  %v84_v30 = vmul.f32 %v283_v11, %v83_v19 }
  0x44   :  { %v285_v15 = vpop.eup %284 }
  0x45   :  { %v287_v16 = vpop.eup %286  ;;  %v94_v17 = vmul.f32 %v285_v15, %v70_v12 }
  0x46   :  { %v95_v18 = vmul.f32 %v287_v16, %v79_v13  ;;  %v289_v20 = vpop.eup %288 }
  0x47   :  { %v96_v21 = vsub.f32 2.0, %v94_v17  ;;  %v81_v29 = vmul.f32 0.6931472, %v289_v20  ;;  %v291_v34 = vpop.eup %290 }
  0x48   :  { %v97_v24 = vsub.f32 2.0, %v95_v18  ;;  %v72_v44 = vmul.f32 0.6931472, %v291_v34 }
  0x49   :  { %v98_v26 = vmul.f32 %v285_v15, %v96_v21  ;;  %v87_v41 = vsel %vm400_vm2, %v84_v30, %v81_v29 }
  0x4a   :  { %v99_v28 = vmul.f32 %v287_v16, %v97_v24  ;;  %v89_v46 = vadd.f32 %v87_v41, %v69_v38  ;;  %v78_v49 = vsel %vm77_vm3, %v75_v45, %v72_v44 }
  0x4b   :  { %v102_v31 = vmul.f32 %v281_v10, %v98_v26  ;;  %v88_v50 = vadd.f32 %v78_v49, %v68_v48 }
  0x4c   :  { %v103_v35 = vmul.f32 %v283_v11, %v99_v28 }
  0x4d   :  { %v104_v37 = vsel %vm100_vm0, %v98_v26, %v102_v31 }
  0x4e   :  { %189 = vadd.xlane.f32.xlu0 %v104_v37  ;;  %v105_v40 = vsel %vm101_vm1, %v99_v28, %v103_v35  ;;  %v114_v47 = vmul.f32 %v104_v37, %v54_v0 }
  0x4f   :  { %v115_v43 = vmul.f32 %v105_v40, %v55_v4 }
  0x51   :  { %173 = vadd.xlane.f32.xlu1 %v115_v43 }
  0x52   :  { %191 = vadd.xlane.f32.xlu0 %v105_v40 }
  0x55   :  { %139 = vadd.xlane.f32.xlu1 %v89_v46 }
  0x56   :  { %171 = vadd.xlane.f32.xlu0 %v114_v47 }
  0x5a   :  { %137 = vadd.xlane.f32.xlu0 %v88_v50 }
  0xb4   :  { %v208_v51 = vpop.xlane.xlu1 %207 }
  0xb5   :  { %v211_v52 = vrot.slane %v208_v51, 4 }
  0xb7   :  { %v212_v55 = vadd.f32 %v211_v52, %v208_v51 }
  0xb8   :  { %v210_v53 = vpop.xlane.xlu1 %209 }
  0xb9   :  { %v217_v54 = vrot.slane %v210_v53, 4  ;;  %v213_v57 = vrot.slane %v212_v55, 2 }
  0xbb   :  { %v218_v56 = vadd.f32 %v217_v54, %v210_v53  ;;  %v214_v61 = vadd.f32 %v213_v57, %v212_v55 }
  0xbd   :  { %v219_v60 = vrot.slane %v218_v56, 2  ;;  %v215_v6 = vrot.slane %v214_v61, 1 }
  0xbf   :  { %v220_v4 = vadd.f32 %v219_v60, %v218_v56  ;;  %v216_v18 = vadd.f32 %v215_v6, %v214_v61 }
  0xc1   :  { %v221_v15 = vrot.slane %v220_v4, 1 }
  0xc3   :  { %v222_v28 = vadd.f32 %v221_v15, %v220_v4 }
  0xdb   :  { %v190_v58 = vpop.xlane.xlu0 %189 }
  0xdc   :  { %v193_v59 = vrot.slane %v190_v58, 4 }
  0xde   :  { %v194_v62 = vadd.f32 %v193_v59, %v190_v58  ;;  %v174_v63 = vpop.xlane.xlu1 %173 }
  0xdf   :  { %v192_v0 = vpop.xlane.xlu0 %191  ;;  %v181_v1 = vrot.slane %v174_v63, 4 }
  0xe0   :  { %v195_v2 = vrot.slane %v194_v62, 2  ;;  %v199_v3 = vrot.slane %v192_v0, 4 }
  0xe1   :  { %v182_v5 = vadd.f32 %v181_v1, %v174_v63 }
  0xe2   :  { %v196_v7 = vadd.f32 %v195_v2, %v194_v62  ;;  %v200_v8 = vadd.f32 %v199_v3, %v192_v0  ;;  %v140_v9 = vpop.xlane.xlu1 %139 }
  0xe3   :  { %v172_v10 = vpop.xlane.xlu0 %171  ;;  %v147_v11 = vrot.slane %v140_v9, 4  ;;  %v183_v16 = vrot.slane %v182_v5, 2 }
  0xe4   :  { %v197_v12 = vrot.slane %v196_v7, 1  ;;  %v201_v13 = vrot.slane %v200_v8, 2  ;;  %v175_v14 = vrot.slane %v172_v10, 4 }
  0xe5   :  { %v148_v17 = vadd.f32 %v147_v11, %v140_v9  ;;  %v184_v29 = vadd.f32 %v183_v16, %v182_v5 }
  0xe6   :  { %v198_v19 = vadd.f32 %v197_v12, %v196_v7  ;;  %v202_v20 = vadd.f32 %v201_v13, %v200_v8  ;;  %v176_v21 = vadd.f32 %v175_v14, %v172_v10 }
  0xe7   :  { %v149_v22 = vrot.slane %v148_v17, 2  ;;  %v138_v23 = vpop.xlane.xlu0 %137  ;;  %v185_v39 = vrot.slane %v184_v29, 1 }
  0xe8   :  { %v227_v24 = vadd.f32 %v216_v18, %v198_v19  ;;  %v203_v25 = vrot.slane %v202_v20, 1  ;;  %v177_v26 = vrot.slane %v176_v21, 2  ;;  %v141_v27 = vrot.slane %v138_v23, 4 }
  0xe9   :  { %v150_v30 = vadd.f32 %v149_v22, %v148_v17  ;;  %v186_v45 = vadd.f32 %v185_v39, %v184_v29 }
  0xea   :  { %v229_v31 = vadd.f32 1e-05, %v227_v24  ;;  %v204_v32 = vadd.f32 %v203_v25, %v202_v20  ;;  %v178_v33 = vadd.f32 %v177_v26, %v176_v21  ;;  %v142_v34 = vadd.f32 %v141_v27, %v138_v23 }
  0xeb   :  { %v151_v35 = vrot.slane %v150_v30, 1  ;;  %v224_v50 = vmul.f32 2.0, %v186_v45 }
  0xec   :  { %292 = vrcp.f32 %v229_v31  ;;  %v228_v36 = vadd.f32 %v222_v28, %v204_v32  ;;  %v179_v37 = vrot.slane %v178_v33, 1  ;;  %v143_v38 = vrot.slane %v142_v34, 2 }
  0xed   :  { %v152_v42 = vadd.f32 %v151_v35, %v150_v30  ;;  %v226_v54 = vadd.f32 1e-05, %v224_v50 }
  0xee   :  { %v230_v40 = vadd.f32 1e-05, %v228_v36  ;;  %v144_v41 = vadd.f32 %v143_v38, %v142_v34  ;;  %v180_v43 = vadd.f32 %v179_v37, %v178_v33 }
  0xef   :  { %v155_v47 = vsel %vm153_vm4, %v152_v42, 0.0 }
  0xf0   :  { %294 = vrcp.f32 %v230_v40  ;;  %v145_v44 = vrot.slane %v144_v41, 1  ;;  %v223_v48 = vmul.f32 2.0, %v180_v43 }
  0xf2   :  { %v146_v46 = vadd.f32 %v145_v44, %v144_v41  ;;  %v225_v53 = vadd.f32 1e-05, %v223_v48 }
  0xf4   :  { %v154_v49 = vsel %vm153_vm4, %v146_v46, 0.0 }
  0xf5   :  { %v156_v51 = vadd.f32 %v155_v47, %v154_v49 }
  0xf6   :  { %v293_v52 = vpop.eup %292 }
  0xf7   :  { %157 = vadd.xlane.f32.xlu0 %v156_v51  ;;  %v232_v55 = vmul.f32 %v293_v52, %v225_v53 }
  0xf9   :  { %v235_v58 = vsel %vm153_vm4, %v232_v55, 0.0 }
  0xfa   :  { %v295_v56 = vpop.eup %294 }
  0xfb   :  { %v234_v57 = vmul.f32 %v295_v56, %v226_v54 }
  0xfd   :  { %v236_v59 = vsel %vm153_vm4, %v234_v57, 0.0 }
  0xfe   :  { %v237_v60 = vadd.f32 %v236_v59, %v235_v58 }
 0x100   :  { %238 = vadd.xlane.f32.xlu1 %v237_v60 }
 0x184   :  { %v158_v61 = vpop.xlane.xlu0 %157 }
 0x185   :  { %v159_v62 = vrot.slane %v158_v61, 4 }
 0x187   :  { %v160_v63 = vadd.f32 %v159_v62, %v158_v61 }
 0x189   :  { %v161_v0 = vrot.slane %v160_v63, 2 }
 0x18b   :  { %v162_v1 = vadd.f32 %v161_v0, %v160_v63 }
 0x18d   :  { %v239_v2 = vpop.xlane.xlu1 %238  ;;  %v163_v3 = vrot.slane %v162_v1, 1 }
 0x18e   :  { %v240_v4 = vrot.slane %v239_v2, 4 }
 0x18f   :  { %v164_v5 = vadd.f32 %v163_v3, %v162_v1 }
 0x190   :  { %v241_v6 = vadd.f32 %v240_v4, %v239_v2 }
 0x191   :  { %271 = vpush %v164_v5 }
 0x192   :  { %v242_v7 = vrot.slane %v241_v6, 2 }
 0x194   :  { %v243_v8 = vadd.f32 %v242_v7, %v241_v6 }
 0x196   :  { %v244_v9 = vrot.slane %v243_v8, 1 }
 0x198   :  { %v245_v10 = vadd.f32 %v244_v9, %v243_v8 }
 0x19a   :  { %273 = vpush %v245_v10 }
 0x1c2   :  { %s272_s1 = spop %271 }
 0x1c3   :  { %s168_s6 = smul.f32 0.00048828125, %s272_s1 }
 0x1c5   :  { %s251_s10 = smul.f32 0.9, %s168_s6 }
 0x1cb   :  { %s274_s7 = spop %273 }
 0x1cc   :  { %s249_s8 = smul.f32 0.5, %s274_s7 }
 0x1ce   :  { %s250_s9 = ssub.f32 1.0, %s249_s8 }
 0x1d0   :  { %s252_s11 = smul.f32 0.1, %s250_s9 }
 0x1d2   :  { %s253_s12 = sadd.f32 %s252_s11, %s251_s10 }
 0x1d4   :  { %255 = sst [smem:[#allocation11]] %s253_s12 }
 0x1d5   :  { %349 = shalt.err (!%p346_p4)
}
 0x1d6   :  { %s360_s20 = smov [#allocation11]  }
 0x1d7   :  { %263 = dma.smem_to_hbm %s360_s20, 16, %s424_s2, [#allocation8]  }
 0x1d8   :  { %354 = dma.done.wait [#allocation8], 16  }
 0x1d9   :  { %355 = vsyncadd [#allocation8], 4294967280 }
 0x1da   :  { %267 = sfence }
 0x1db   :  { %268 = vsyncpa [#allocation7], 1 }
 0x1dc   :  { %269 = vsyncpa [#allocation10], 1 }
 0x1dd   :  { %270 = vsyncpa [#allocation8], 1 }

</bundles_post_ra>
